<compile_context>
chip_gen: v6e
topology: v6e:2x2x1
jax: 0.10.0
libtpu: 0.0.40
codegen_flags: <defaults>
</compile_context>

<pallas_src>
import jax
import jax.numpy as jnp
from jax.experimental import pallas as pl
from jax.experimental.pallas import tpu as pltpu


def _calc_padding(lin, kernel, stride=1, dilation=1):
    # identical to ConvBlock._calc_padding
    return int(((lin - 1) * stride + 1 + dilation * (kernel - 1) - lin) / 2)


def conv_block_kernel(x_ref, w_ref, b_ref, o_ref):
    """x_ref: (1, T_pad, C_in)  zero-padded input, one batch element per grid step
       w_ref: (K*C_in, F)       conv weight, im2col-flattened, row order = (k, c)
       b_ref: (1, F)            conv bias (f32)
       o_ref: (1, T_out, F)     relu(conv(x)) output
    """
    t_out = o_ref.shape[1]
    c_in = x_ref.shape[2]
    k = w_ref.shape[0] // c_in

    x = x_ref[0]                                                       # (T_pad, C_in)
    # im2col: fuse all K taps into a single MXU matmul.
    cols = jnp.concatenate([x[i:i + t_out, :] for i in range(k)], axis=-1)  # (T_out, K*C_in)
    acc = jnp.dot(cols.astype(w_ref.dtype), w_ref[...],
                  preferred_element_type=jnp.float32)                  # f32 accumulation
    acc = acc + b_ref[...].astype(jnp.float32)                         # single hoisted broadcast
    o_ref[0] = jnp.maximum(acc, 0.0).astype(o_ref.dtype)               # fused ReLU


def conv_block(x, w, b):
    """x: (B, T, C_in) feature-last.
       w: (K, C_in, F)  == torch Conv1d weight (F, C_in, K) transposed to (K, C_in, F).
       b: (F,)
       returns (B, T, F) == torch ConvBlock output (already permuted back)."""
    B, T, C_in = x.shape
    K, _, F = w.shape
    pad = _calc_padding(T, K)
    x_pad = jnp.pad(x, ((0, 0), (pad, pad), (0, 0)))
    T_pad = T + 2 * pad
    l_conv = T_pad - K + 1

    w_flat = w.reshape(K * C_in, F)            # im2col-flattened weight (row order (k, c))
    b2 = b.reshape(1, F).astype(jnp.float32)

    y = pl.pallas_call(
        conv_block_kernel,
        out_shape=jax.ShapeDtypeStruct((B, l_conv, F), jnp.float32),
        grid_spec=pltpu.PrefetchScalarGridSpec(
            num_scalar_prefetch=0,
            grid=(B,),
            in_specs=[
                pl.BlockSpec((1, T_pad, C_in), lambda i: (i, 0, 0)),
                pl.BlockSpec((K * C_in, F), lambda i: (0, 0)),   # weights grid-invariant
                pl.BlockSpec((1, F), lambda i: (0, 0)),          # bias grid-invariant
            ],
            out_specs=pl.BlockSpec((1, l_conv, F), lambda i: (i, 0, 0)),
        ),
        compiler_params=pltpu.CompilerParams(
            dimension_semantics=("parallel",)),   # batch axis -> both TCs on v7x
    )(x_pad, w_flat, b2)

    # AdaptiveMaxPool1d(timesteps): identity whenever l_conv == T (always true for the
    # module's default odd filter_size). General (even-kernel) case uses static bins.
    if l_conv != T:
        bins = []
        for i in range(T):
            s = (i * l_conv) // T
            e = -((-(i + 1) * l_conv) // T)
            bins.append(jnp.max(y[:, s:e, :], axis=1, keepdims=True))
        y = jnp.concatenate(bins, axis=1)
    return y


def conv_block_ref(x, w, b):
    """Pure-JAX reference mirroring the PyTorch forward."""
    B, T, C_in = x.shape
    K, _, F = w.shape
    pad = _calc_padding(T, K)
    xp = jnp.pad(x, ((0, 0), (pad, pad), (0, 0)))
    l_conv = T + 2 * pad - K + 1
    y = jnp.zeros((B, l_conv, F), jnp.float32) + b.reshape(1, 1, F)
    for k in range(K):
        y = y + jnp.einsum('btc,cf->btf', xp[:, k:k + l_conv, :], w[k])
    y = jnp.maximum(y, 0.0)
    if l_conv != T:
        bins = []
        for i in range(T):
            s = (i * l_conv) // T
            e = -((-(i + 1) * l_conv) // T)
            bins.append(jnp.max(y[:, s:e, :], axis=1, keepdims=True))
        y = jnp.concatenate(bins, axis=1)
    return y


if __name__ == "__main__":
    # Small shapes consistent with the module: batch=2, timesteps=16, in_channels=4,
    # n_filters=32, filter_size=5.
    B, T, C_in, F, K = 2, 16, 4, 32, 5

    key = jax.random.PRNGKey(0)
    k1, k2, k3 = jax.random.split(key, 3)
    x = jax.random.normal(k1, (B, T, C_in), dtype=jnp.float32)
    # torch Conv1d weight (F, C_in, K) stored transposed as (K, C_in, F)
    w = 0.1 * jax.random.normal(k2, (K, C_in, F), dtype=jnp.float32)
    b = 0.1 * jax.random.normal(k3, (F,), dtype=jnp.float32)

    # f32 path (exact vs reference)
    y = conv_block(x, w, b)
    jax.block_until_ready(y)
    y_ref = conv_block_ref(x, w, b)
    assert y.shape == (B, T, F)
    assert jnp.allclose(y, y_ref, atol=1e-5, rtol=1e-5)

    # bf16-weight path (v6e/v7x MXU full rate, f32 accumulation) — looser tolerance
    y_bf16 = conv_block(x, w.astype(jnp.bfloat16), b)
    jax.block_until_ready(y_bf16)
    assert jnp.allclose(y_bf16, y_ref, atol=3e-2, rtol=3e-2)

    print("KERNEL_OK")
</pallas_src>

<mosaic_0001>
module attributes {stable_mosaic.version = 11 : i64} {
  func.func @conv_block_kernel(%arg0: i32, %arg1: memref<1x20x4xf32, #tpu.memory_space<vmem>>, %arg2: memref<20x32xf32, #tpu.memory_space<vmem>>, %arg3: memref<1x32xf32, #tpu.memory_space<vmem>>, %arg4: memref<1x16x32xf32, #tpu.memory_space<vmem>>) attributes {dimension_semantics = [#tpu.dimension_semantics<parallel>], iteration_bounds = array<i64: 2>, scalar_prefetch = 0 : i64, scratch_operands = 0 : i64, tpu.core_type = #tpu.core_type<tc>, window_params = [{transform_indices = @transform_0, window_bounds = array<i64: 1, 20, 4>}, {pipeline_mode = #tpu.pipeline_mode<synchronous>, transform_indices = @transform_1, window_bounds = array<i64: 20, 32>}, {pipeline_mode = #tpu.pipeline_mode<synchronous>, transform_indices = @transform_2, window_bounds = array<i64: 1, 32>}, {transform_indices = @transform_3, window_bounds = array<i64: 1, 16, 32>}]} {
    %c0 = arith.constant 0 : index
    %c0_0 = arith.constant 0 : index
    %c0_1 = arith.constant 0 : index
    %0 = vector.load %arg1[%c0, %c0_0, %c0_1] : memref<1x20x4xf32, #tpu.memory_space<vmem>>, vector<1x20x4xf32>
    %1 = vector.shape_cast %0 : vector<1x20x4xf32> to vector<20x4xf32>
    %2 = vector.extract_strided_slice %1 {offsets = [0, 0], sizes = [16, 4], strides = [1, 1]} : vector<20x4xf32> to vector<16x4xf32>
    %3 = vector.extract_strided_slice %1 {offsets = [1, 0], sizes = [16, 4], strides = [1, 1]} : vector<20x4xf32> to vector<16x4xf32>
    %4 = vector.extract_strided_slice %1 {offsets = [2, 0], sizes = [16, 4], strides = [1, 1]} : vector<20x4xf32> to vector<16x4xf32>
    %5 = vector.extract_strided_slice %1 {offsets = [3, 0], sizes = [16, 4], strides = [1, 1]} : vector<20x4xf32> to vector<16x4xf32>
    %6 = vector.extract_strided_slice %1 {offsets = [4, 0], sizes = [16, 4], strides = [1, 1]} : vector<20x4xf32> to vector<16x4xf32>
    %7 = tpu.concatenate %2, %3, %4, %5, %6 in 1 : vector<16x4xf32>, vector<16x4xf32>, vector<16x4xf32>, vector<16x4xf32>, vector<16x4xf32> -> vector<16x20xf32>
    %c0_2 = arith.constant 0 : index
    %c0_3 = arith.constant 0 : index
    %8 = vector.load %arg2[%c0_2, %c0_3] : memref<20x32xf32, #tpu.memory_space<vmem>>, vector<20x32xf32>
    %cst = arith.constant dense<0.000000e+00> : vector<16x32xf32>
    %9 = tpu.matmul %7, %8, %cst {dimension_numbers = #tpu.dot_dimension_numbers<[1], [0], [0], [1], [0, 0, 1, 1], [], []>} : vector<16x20xf32>, vector<20x32xf32>, vector<16x32xf32> -> vector<16x32xf32>
    %c0_4 = arith.constant 0 : index
    %c0_5 = arith.constant 0 : index
    %10 = vector.load %arg3[%c0_4, %c0_5] : memref<1x32xf32, #tpu.memory_space<vmem>>, vector<1x32xf32>
    %11 = vector.broadcast %10 : vector<1x32xf32> to vector<16x32xf32>
    %12 = arith.addf %9, %11 : vector<16x32xf32>
    %cst_6 = arith.constant 0.000000e+00 : f32
    %13 = vector.broadcast %cst_6 : f32 to vector<16x32xf32>
    %14 = arith.maximumf %12, %13 : vector<16x32xf32>
    %c0_7 = arith.constant 0 : index
    %c0_8 = arith.constant 0 : index
    %c0_9 = arith.constant 0 : index
    %15 = vector.load %arg4[%c0_7, %c0_8, %c0_9] : memref<1x16x32xf32, #tpu.memory_space<vmem>>, vector<1x16x32xf32>
    %16 = vector.shape_cast %15 : vector<1x16x32xf32> to vector<16x32xf32>
    %17 = vector.shape_cast %14 : vector<16x32xf32> to vector<1x16x32xf32>
    tpu.vector_store %arg4[%c0_7, %c0_8, %c0_9], %17 {strides = array<i32>} : memref<1x16x32xf32, #tpu.memory_space<vmem>>, vector<1x16x32xf32>,
    return
  }
  func.func @transform_0(%arg0: i32) -> (i32, i32, i32) {
    %c0_i32 = arith.constant 0 : i32
    %c0_i32_0 = arith.constant 0 : i32
    %c0_i32_1 = arith.constant 0 : i32
    return %arg0, %c0_i32, %c0_i32_0 : i32, i32, i32
  }
  func.func @transform_1(%arg0: i32) -> (i32, i32) {
    %c0_i32 = arith.constant 0 : i32
    %c0_i32_0 = arith.constant 0 : i32
    %c0_i32_1 = arith.constant 0 : i32
    return %c0_i32, %c0_i32_0 : i32, i32
  }
  func.func @transform_2(%arg0: i32) -> (i32, i32) {
    %c0_i32 = arith.constant 0 : i32
    %c0_i32_0 = arith.constant 0 : i32
    %c0_i32_1 = arith.constant 0 : i32
    return %c0_i32, %c0_i32_0 : i32, i32
  }
  func.func @transform_3(%arg0: i32) -> (i32, i32, i32) {
    %c0_i32 = arith.constant 0 : i32
    %c0_i32_0 = arith.constant 0 : i32
    %c0_i32_1 = arith.constant 0 : i32
    return %arg0, %c0_i32, %c0_i32_0 : i32, i32, i32
  }
}

</mosaic_0001>

<bundles_post_ra>
// kernel: tpu_custom_call.1
= control target key start
LH: loop header
LB: loop body
LE: loop exit
PB: predicated region body
PF: predicated region fallthrough
CT: control target
= control target key end

     0   :  { %8 = vsyncpa [#allocation3], 0  ;;  %s699_s0 = inlined_call_operand.vmem [shape: f32[2,20,4], index: 0, kind: input, shape index: {}]   ;;  %s700_s1 = inlined_call_operand.vmem [shape: f32[20,32], index: 1, kind: input, shape index: {}]   ;;  %s701_s2 = inlined_call_operand.vmem [shape: f32[1,32], index: 2, kind: input, shape index: {}]   ;;  %s702_s3 = inlined_call_operand.hbm [shape: f32[2,16,32], index: 3, kind: output, shape index: {}]  }
   0x1   :  { %10 = vsyncpa [#allocation3 + $0x1], 0  ;;  %s574_s12 = smov 0   ;;  %s576_s13 = smov 0  }
   0x2   :  { %s578_s14 = smov 0   ;;  %s580_s15 = smov 0  }
   0x3 LB: > { %s595_s16 = sadd.s32 4294967295, %s546_s15   ;;  %s411_s17 = sadd.s32 4294967294, %s546_s15   ;;  %s546_s15 = sphi %s580_s15, %s708_s15   ;;  %s542_s14 = sphi %s578_s14, %s707_s14   ;;  %s538_s13 = sphi %s576_s13, %s706_s13   ;;  %s534_s12 = sphi %s574_s12, %s705_s12  }
   0x4   : > { %s599_s18 = sadd.s32 1, %s546_s15   ;;  %s91_s19 = sadd.s32 1, %s542_s14 }
   0x5   : > { %s88_s20 = ssub.s32 %s546_s15, %s599_s18  ;;  %p101_p0 = scmp.ne.s32.totalorder %s542_s14, %s538_s13 }
   0x6   : > { %p89_p1 = scmp.eq.s32.totalorder %s88_s20, 0  ;;  %p102_p2 = scmp.eq.s32.totalorder %s595_s16, 1 }
   0x7   : > { %p107_p3 = scmp.ne.s32.totalorder %s538_s13, %s534_s12  ;;  %p108_p4 = scmp.eq.s32.totalorder %s411_s17, 1 }
   0x8   : > { %s610_s21 = scalar_select %p89_p1, %s542_s14, %s91_s19  }
   0x9   : > { %p612_p5 = por %p102_p2, %p101_p0  ;;  %p616_p6 = por %p108_p4, %p107_p3 }
   0xa   : > { %p414_p7 = scmp.ge.s32.totalorder %s546_s15, 1  ;;  %p140_p8 = scmp.lt.s32.totalorder %s546_s15, 3 }
   0xc   : > { %p141_p9 = pnand %p414_p7, %p140_p8 }
   0xd   : > { %p164_p10 = scmp.lt.s32.totalorder (!%p141_p9), %s595_s16, 1  ;;  %s548_s8 = smov (!%p141_p9), 8  }
   0xe   : > { %144 = sbr.rel (%p141_p9) target bundleno = 370 (0x172), region = 32  ;;  %s549_s9 = smov (!%p141_p9), 4  }
   0xf   : > { %s550_s10 = smov (!%p141_p9), 12   ;;  %s551_s11 = smov (!%p141_p9), 16  }
  0x10   : > { %s161_s17 = sand.u32 (!%p141_p9), 1, %s538_s13   ;;  %s426_s27 = sshll.u32 (!%p141_p9), %s595_s16, 8 }
  0x11   : > { %s415_s19 = sshll.u32 (!%p141_p9), %s161_s17, 4  ;;  %s658_s4 = scalar_lea.sflag (!%p141_p9), [#allocation3], %s161_s17 }
  0x13   : > { %s165_s24 = scalar_select %p164_p10, %s595_s16, 1  ;;  %vm211_vm0 = vcmask 1043456   ;;  %v237_v0 = vld [vmem:[%s700_s1 + $0x10] sm:$0xf]  ;;  %v236_v1 = vld [vmem:[%s700_s1 + $0x8] sm:$0xff]  ;;  %vm187_vm1 = vcmask 1045504  }
  0x14   : > { %432 = vmatprep.subr.msk.mxu0 %vm211_vm0, %v237_v0  ;;  %vm175_vm2 = vcmask 1046528   ;;  %v235_v11 = vld [vmem:[%s700_s1] sm:$0xff]  ;;  %vm199_vm3 = vcmask 1044480   ;;  %vm223_vm4 = vcmask 31744   ;;  %vm226_vm5 = vcmask 64512   ;;  %s552_s16 = smov [#allocation2]  }
  0x15   : > { %s441_s25 = smul.u32 24, %s165_s24  ;;  %433 = vmatpush3.msk.msra.mxu0 %vm211_vm0, %v237_v0  ;;  %vm229_vm6 = vcmask 97280   ;;  %vm232_vm7 = vcmask 130048   ;;  %vm245_vm8 = vcmask 162816   ;;  %v417_v42 = vld [vmem:[%s701_s2] ss:$0 sm:$0xff] }
  0x16   : > { %434 = vmatprep.subr.mxu0 %v236_v1  ;;  %vm332_vm9 = vcmask 261120   ;;  %s490_s6 = sshll.u32 %s552_s16, 4  ;;  %s491_s6 = int_to_ptr.vmem [resolvable:$false] %s490_s6 }
  0x17   : > { %s168_s30 = scalar_lea.vmem %s699_s0, %s441_s25  ;;  %435 = vmatpush3.msra.mxu0 %v236_v1  ;;  %s163_s25 = scalar_lea.vmem [#allocation2], %s415_s19 }
  0x18   : > { %v169_v2 = vld [vmem:[%s168_s30] sm:$0xff]  ;;  %v170_v3 = vld [vmem:[%s168_s30 + $0x8] sm:$0xff]  ;;  %v171_v4 = vld [vmem:[%s168_s30 + $0x10] sm:$0xf]  ;;  %436 = vmatprep.subr.mxu0 %v235_v11  ;;  %s349_s26 = sshll.u32 %s163_s25, 4  ;;  %s656_s30 = scalar_lea.hbm %s702_s3, %s426_s27  ;;  %s651_s26 = int_to_ptr.vmem [resolvable:$true] %s349_s26 }
  0x19   : > { %v188_v5 = vrot.slane %v169_v2, 2  ;;  %v189_v6 = vrot.slane %v170_v3, 2  ;;  %v176_v7 = vrot.slane %v169_v2, 1  ;;  %v177_v8 = vrot.slane %v170_v3, 1  ;;  %437 = vmatpush3.msra.mxu0 %v235_v11  ;;  %s486_s5 = scalar_lea.vmem %s651_s26, 256  ;;  %s492_s7 = scalar_lea.vmem %s491_s6, 512 }
  0x1a   : > { %v191_v9 = vrot.slane %v171_v4, 2  ;;  %v179_v10 = vrot.slane %v171_v4, 1  ;;  %v201_v14 = vrot.slane %v170_v3, 3  ;;  %v203_v17 = vrot.slane %v171_v4, 3  ;;  %p487_p11 = scmp.ne.s32.totalorder %s651_s26, %s486_s5  ;;  %p493_p0 = scmp.lt.s32.totalorder %s651_s26, %s491_s6 }
  0x1b   : > { %v190_v12 = vsel %vm187_vm1, %v188_v5, %v189_v6  ;;  %v178_v13 = vsel %vm175_vm2, %v176_v7, %v177_v8  ;;  %v200_v18 = vrot.slane %v169_v2, 3  ;;  %v213_v19 = vrot.slane %v170_v3, 4  ;;  %p494_p1 = scmp.lt.s32.totalorder %s492_s7, %s486_s5 }
  0x1c   : > { %193 = vrot.lane.b32.xlu1 %v190_v12, %s548_s8  ;;  %181 = vrot.lane.b32.xlu0 %v178_v13, %s549_s9  ;;  %v192_v15 = vsel %vm187_vm1, %v189_v6, %v191_v9  ;;  %v180_v16 = vsel %vm175_vm2, %v177_v8, %v179_v10  ;;  %v204_v20 = vsel %vm199_vm3, %v201_v14, %v203_v17  ;;  %v215_v22 = vrot.slane %v171_v4, 4  ;;  %p488_p12 = pnand %p487_p11, %p612_p5 }
  0x1d   : > { %v202_v21 = vsel %vm199_vm3, %v200_v18, %v201_v14  ;;  %v212_v23 = vrot.slane %v169_v2, 4  ;;  %p495_p2 = por %p494_p1, %p493_p0 }
  0x1e   : > { %v216_v24 = vsel %vm211_vm0, %v213_v19, %v215_v22  ;;  %p489_p13 = pneg %p488_p12 }
  0x1f   : > { %v214_v25 = vsel %vm211_vm0, %v212_v23, %v213_v19 }
  0x20   : > { %195 = vrot.lane.b32.xlu1 %v192_v15, %s548_s8  ;;  %183 = vrot.lane.b32.xlu0 %v180_v16, %s549_s9  ;;  %p496_p3 = pnand %p495_p2, %p489_p13 }
  0x24   : > { %207 = vrot.lane.b32.xlu1 %v204_v20, %s550_s10  ;;  %205 = vrot.lane.b32.xlu0 %v202_v21, %s550_s10 }
  0x28   : > { %219 = vrot.lane.b32.xlu1 %v216_v24, %s551_s11  ;;  %217 = vrot.lane.b32.xlu0 %v214_v25, %s551_s11 }
  0x8e   : > { %v194_v26 = vpop.permute.xlu1 %193  ;;  %v182_v27 = vpop.permute.xlu0 %181 }
  0x8f   : > { %v224_v30 = vsel %vm223_vm4, %v169_v2, %v182_v27 }
  0x90   : > { %v227_v35 = vsel %vm226_vm5, %v224_v30, %v194_v26 }
  0x92   : > { %v196_v28 = vpop.permute.xlu1 %195  ;;  %v184_v29 = vpop.permute.xlu0 %183 }
  0x93   : > { %v225_v31 = vsel %vm223_vm4, %v170_v3, %v184_v29 }
  0x94   : > { %v228_v34 = vsel %vm226_vm5, %v225_v31, %v196_v28 }
  0x96   : > { %v208_v32 = vpop.permute.xlu1 %207  ;;  %v206_v33 = vpop.permute.xlu0 %205 }
  0x97   : > { %v231_v36 = vsel %vm229_vm6, %v228_v34, %v208_v32  ;;  %v230_v37 = vsel %vm229_vm6, %v227_v35, %v206_v33 }
  0x9a   : > { %v220_v38 = vpop.permute.xlu1 %219  ;;  %v218_v39 = vpop.permute.xlu0 %217 }
  0x9b   : > { %v234_v40 = vsel %vm232_vm7, %v231_v36, %v220_v38  ;;  %v233_v41 = vsel %vm232_vm7, %v230_v37, %v218_v39 }
  0x9c   : > { %438 = vmatprep.mubr.msk.f32.mxu0 %vm245_vm8, %v233_v41 }
  0x9d   : > { %439 = vmatmul.mubr.msk.f32.vlgmr.msra.gmra.mxu0 %vm245_vm8, %v234_v40 }
 0x15d   : > { %v440_v43 = vpop.f32.mrf.mxu0 }
 0x15e   : > { %v327_v44 = vadd.f32 %v440_v43, %v417_v42 }
 0x15f   : > { %v321_v45 = vpop.f32.mrf.mxu0 }
 0x160   : > { %v331_v46 = vmax.f32 %v327_v44, 0.0  ;;  %v322_v47 = vadd.f32 %v417_v42, %v321_v45 }
 0x162   : > { %334 = vst.msk [vmem:[%s163_s25 + $0x8] sm:$0xff] %vm332_vm9, %v331_v46  ;;  %v330_v48 = vmax.f32 %v322_v47, 0.0 }
 0x164   : > { %333 = vst.msk [vmem:[%s163_s25] sm:$0xff] %vm332_vm9, %v330_v48 }
 0x165   : > { %499 = shalt.err (!%p496_p3)
}
 0x166   : > { %s500_s9 = scalar_lea.hbm %s656_s30, 256  ;;  %s504_s17 = scalar_lea.hbm %s702_s3, 512 }
 0x167   : > { %p501_p4 = scmp.ne.s32.totalorder %s656_s30, %s500_s9  ;;  %p505_p9 = scmp.lt.s32.totalorder %s656_s30, %s702_s3 }
 0x168   : > { %p506_p10 = scmp.lt.s32.totalorder %s504_s17, %s500_s9 }
 0x169   : > { %p502_p7 = pnand %p501_p4, %p612_p5 }
 0x16a   : > { %p507_p11 = por %p506_p10, %p505_p9 }
 0x16b   : > { %p503_p8 = pneg %p502_p7 }
 0x16d   : > { %p508_p12 = pnand %p507_p11, %p503_p8 }
 0x16f   : > { %511 = shalt.err (!%p508_p12)
}
 0x170   : > { %s553_s24 = smov 128  }
 0x171   : > { %442 = dma.vmem_to_hbm [thread:$0]  (%p612_p5), %s651_s26, 256, %s656_s30, %s658_s4, %s553_s24, %s553_s24, %s548_s8  }
 0x172 PF: > { %p448_p13 = scmp.ge.s32.totalorder %s546_s15, 2  ;;  %s364_s25 = sand.u32 1, %s534_s12  }
 0x173   : > { %s365_s27 = scalar_lea.sflag [#allocation3], %s364_s25 }
 0x174   : > { %p445_p0 = pnand %p448_p13, %p616_p6 }
 0x176   : > { %p446_p1 = pneg %p445_p0 }
 0x178   : > { %529 = dma.done.wait (%p446_p1), %s365_s27, 256  }
 0x179   : > { %531 = vsyncadd (%p446_p1), %s365_s27, 4294967040  ;;  %p13_p2 = scmp.ge.s32.totalorder %s599_s18, 4   ;;  %s705_s12 = smov %s538_s13 }
 0x17a   : > { %s706_s13 = smov %s542_s14  ;;  %s707_s14 = smov %s610_s21 }
 0x17b   : > { %s708_s15 = smov %s599_s18  ;;  %15 = sbr.rel (!%p13_p2) target bundleno = 3 (0x3), region = 67 }
 0x180   :  { %370 = vsyncpa [#allocation3], 1 }
 0x181   :  { %372 = vsyncpa [#allocation3 + $0x1], 1 }

</bundles_post_ra>
